<compile_context>
chip_gen: v7x
topology: tpu7x:2x2x1
jax: 0.10.0
libtpu: 0.0.40
codegen_flags: <defaults>
</compile_context>

<pallas_src>
import functools

import jax
import jax.numpy as jnp
from jax import lax
from jax.experimental import pallas as pl
from jax.experimental.pallas import tpu as pltpu

EPS = 1e-5          # torch.nn.InstanceNorm2d default eps
NEG_SLOPE = 0.2     # LeakyReLU(0.2)


# ----------------------------------------------------------------------------
# pltpu.roll direction probe (run once, cached).  We only rely on "a" circular
# lane rotation; the sign convention is established empirically so every conv
# tap is paired with the right weights regardless of the rotate direction.
# ----------------------------------------------------------------------------
def _roll_probe_kernel(x_ref, o_ref):
    o_ref[...] = pltpu.roll(x_ref[...], shift=1, axis=1)


@functools.lru_cache(maxsize=None)
def _roll_shift_sign():
    """Returns s in {-1, +1} such that
    pltpu.roll(x, (s*d) % n, axis=-1)[..., p] == x[..., (p + d) % n]."""
    n = 256
    x = jnp.arange(n, dtype=jnp.float32).reshape(1, n)
    r = pl.pallas_call(
        _roll_probe_kernel,
        out_shape=jax.ShapeDtypeStruct((1, n), jnp.float32),
    )(x)
    first = int(jax.device_get(r)[0, 0])
    assert first in (1, n - 1), f"unexpected pltpu.roll behaviour: {first}"
    # numpy-style roll (r[p] == x[p-1])  ->  first == n-1  ->  use shift = -d.
    return -1 if first == n - 1 else +1


# ----------------------------------------------------------------------------
# Fused kernel
# ----------------------------------------------------------------------------
def _conv_in_lrelu(x, w2d, gamma, beta, tap_masks, *, H, W, TB, roll_sign,
                   mm_dtype):
    """3x3 'same' conv (bias omitted: cancelled by InstanceNorm) + InstanceNorm
    (affine, biased variance, per image) + LeakyReLU(0.2).
    x: (Cp, TB*HW) f32; w2d: (Cp, 9*Cp) in mm_dtype; gamma/beta: (Cp, 1)."""
    HW = H * W
    N = TB * HW
    Cp = x.shape[0]

    # --- im2col taps: lane-rolled copies of x; border taps zeroed by the
    #     per-tap validity mask (this *is* the zero 'same' padding). ----------
    taps = []
    for kh in range(3):
        for kw in range(3):
            dh, dw = kh - 1, kw - 1
            if dh == 0 and dw == 0:
                taps.append(x)                               # centre: no mask
            else:
                d = dh * W + dw
                t = pltpu.roll(x, shift=(roll_sign * d) % N, axis=1)
                taps.append(t * tap_masks[(dh, dw)])

    if Cp >= 128:
        # Large C: 9 accumulating K=Cp matmuls -> never materialize 9x patch.
        acc = None
        for idx, t in enumerate(taps):
            w_tap = w2d[:, idx * Cp:(idx + 1) * Cp]
            c = jnp.dot(w_tap, t.astype(mm_dtype),
                        preferred_element_type=jnp.float32)
            acc = c if acc is None else acc + c
    else:
        # Small C: one MXU matmul with K = 9*Cp keeps the MXU K-dim fed.
        patch = jnp.concatenate(taps, axis=0).astype(mm_dtype)   # (9*Cp, N)
        acc = jnp.dot(w2d, patch, preferred_element_type=jnp.float32)

    # --- InstanceNorm2d (affine) + LeakyReLU, per image ---------------------
    inv_hw = 1.0 / float(HW)
    outs = []
    for t in range(TB):
        a = acc[:, t * HW:(t + 1) * HW] if TB > 1 else acc
        mean = jnp.sum(a, axis=1, keepdims=True) * inv_hw
        # Single-pass (clamped) variance; activations here are O(1) so the
        # E[x^2]-E[x]^2 cancellation is well within tolerance.
        var = jnp.maximum(
            jnp.sum(a * a, axis=1, keepdims=True) * inv_hw - mean * mean, 0.0)
        scale = gamma * lax.rsqrt(var + EPS)          # (Cp, 1)
        shift = beta - mean * scale                   # (Cp, 1)
        y = a * scale + shift                         # folded affine: 2 passes
        outs.append(jnp.maximum(y, NEG_SLOPE * y))    # LeakyReLU: mul + max
    return jnp.concatenate(outs, axis=1) if TB > 1 else outs[0]


def _res_block_kernel(x_ref, w1_ref, w2_ref, p_ref, o_ref, *,
                      H, W, C, TB, roll_sign, mm_dtype):
    HW = H * W
    N = TB * HW

    # Per-tap border-validity masks, generated in-kernel (no HBM traffic).
    pos = lax.broadcasted_iota(jnp.int32, (1, N), 1)
    hh = (pos // W) % H                 # per-image row index
    ww = pos % W                        # per-image col index (HW % W == 0)
    tap_masks = {}
    for dh in (-1, 0, 1):
        for dw in (-1, 0, 1):
            if dh == 0 and dw == 0:
                continue
            conds = []
            if dh == -1:
                conds.append(hh >= 1)
            elif dh == 1:
                conds.append(hh <= H - 2)
            if dw == -1:
                conds.append(ww >= 1)
            elif dw == 1:
                conds.append(ww <= W - 2)
            m = conds[0]
            for c in conds[1:]:
                m = m & c
            tap_masks[(dh, dw)] = m.astype(jnp.float32)

    # TB images side by side on the lane axis.
    if TB == 1:
        x = x_ref[0]                                         # (Cp, HW)
    else:
        x = jnp.concatenate([x_ref[t] for t in range(TB)], axis=1)  # (Cp, N)

    prm = p_ref[...]                                         # (Cp, 4)
    g1, b1 = prm[:, 0:1], prm[:, 1:2]
    g2, b2 = prm[:, 2:3], prm[:, 3:4]

    y = _conv_in_lrelu(x, w1_ref[...], g1, b1, tap_masks,
                       H=H, W=W, TB=TB, roll_sign=roll_sign, mm_dtype=mm_dtype)
    y = _conv_in_lrelu(y, w2_ref[...], g2, b2, tap_masks,
                       H=H, W=W, TB=TB, roll_sign=roll_sign, mm_dtype=mm_dtype)

    # Residual add from the input already resident in VMEM; drop channel pad.
    for t in range(TB):
        o_ref[t] = y[:C, t * HW:(t + 1) * HW] + x[:C, t * HW:(t + 1) * HW]


# ----------------------------------------------------------------------------
# Wrapper-side parameter prep / tiling choice
# ----------------------------------------------------------------------------
def _prep_conv_weight(w, C, Cp, mm_dtype):
    """w: (C, C, 3, 3) OIHW -> (Cp, 9*Cp) matrix; column index is
    (kh*3 + kw)*Cp + cin, matching the in-kernel tap order."""
    wp = jnp.zeros((Cp, Cp, 3, 3), jnp.float32).at[:C, :C].set(w)
    return jnp.transpose(wp, (0, 2, 3, 1)).reshape(Cp, 9 * Cp).astype(mm_dtype)


def _pick_tb(B, HW):
    """Images per grid step: aim for ~4k lanes of matmul N to amortize the
    per-step pipeline overhead, but keep >= 2 grid steps when B allows so both
    v7x TensorCores get work.  TB always divides B."""
    target = max(1, 4096 // max(HW, 1))
    tb = 1
    for cand in range(1, B + 1):
        if B % cand == 0 and cand <= target:
            tb = cand
    if B >= 2 and B // tb < 2:
        for cand in range(tb, 0, -1):
            if B % cand == 0 and B // cand >= 2:
                tb = cand
                break
    return tb


@functools.partial(jax.jit, static_argnums=(3, 4))
def _res_block_impl(x_nchw, params1, params2, roll_sign, mm_dtype):
    B, C, H, W = x_nchw.shape
    HW = H * W
    Cp = ((C + 7) // 8) * 8            # channels padded to the f32 sublane tile

    # NCHW -> (B, C, H*W) is a pure reshape: no transpose, no data movement.
    # (For real workloads with HW not a multiple of 128, additionally pad HW to
    #  a 128 multiple to keep stores unmasked; correctness holds either way.)
    x = x_nchw.reshape(B, C, HW).astype(jnp.float32)
    if Cp != C:
        x = jnp.pad(x, ((0, 0), (0, Cp - C), (0, 0)))        # tiny channel pad

    w1, _, g1, be1 = params1           # conv bias unused: cancelled by IN mean
    w2, _, g2, be2 = params2
    w1_2d = _prep_conv_weight(w1, C, Cp, mm_dtype)
    w2_2d = _prep_conv_weight(w2, C, Cp, mm_dtype)
    prm = jnp.zeros((Cp, 4), jnp.float32)
    prm = prm.at[:C, 0].set(g1).at[:C, 1].set(be1)
    prm = prm.at[:C, 2].set(g2).at[:C, 3].set(be2)

    TB = _pick_tb(B, HW)
    grid = (B // TB,)

    kernel = functools.partial(_res_block_kernel, H=H, W=W, C=C, TB=TB,
                               roll_sign=roll_sign, mm_dtype=mm_dtype)

    # Advisory cost estimate so XLA schedules the fused call sensibly.
    mm_bytes = jnp.dtype(mm_dtype).itemsize
    flops = 2 * (2 * Cp * (9 * Cp) * HW) * B          # two convs per image
    bytes_accessed = ((x.size + B * C * HW + prm.size) * 4
                      + (w1_2d.size + w2_2d.size) * mm_bytes)
    cost = pl.CostEstimate(flops=int(flops),
                           transcendentals=int(2 * B * Cp),
                           bytes_accessed=int(bytes_accessed))

    # Rough per-step VMEM need; raise the scoped limit only when required.
    patch_bytes = ((9 * Cp * TB * HW * mm_bytes) if Cp < 128
                   else (Cp * TB * HW * mm_bytes))
    step_bytes = (2 * TB * Cp * HW * 4                 # double-buffered input
                  + 2 * TB * C * HW * 4                # double-buffered output
                  + 2 * 2 * 9 * Cp * Cp * mm_bytes     # weights (2 convs)
                  + patch_bytes
                  + 6 * Cp * TB * HW * 4)              # f32 temporaries
    cp_kwargs = dict(dimension_semantics=("parallel",))
    if step_bytes > 24 * 1024 * 1024:
        cp_kwargs["vmem_limit_bytes"] = int(min(step_bytes * 5 // 4,
                                                100 * 1024 * 1024))

    out = pl.pallas_call(
        kernel,
        out_shape=jax.ShapeDtypeStruct((B, C, HW), jnp.float32),
        grid=grid,
        in_specs=[
            pl.BlockSpec((TB, Cp, HW), lambda b: (b, 0, 0)),   # TB images
            pl.BlockSpec((Cp, 9 * Cp), lambda b: (0, 0)),      # conv1 weights
            pl.BlockSpec((Cp, 9 * Cp), lambda b: (0, 0)),      # conv2 weights
            pl.BlockSpec((Cp, 4), lambda b: (0, 0)),           # g1,b1,g2,b2
        ],
        out_specs=pl.BlockSpec((TB, C, HW), lambda b: (b, 0, 0)),
        compiler_params=pltpu.CompilerParams(**cp_kwargs),
        cost_estimate=cost,
    )(x, w1_2d, w2_2d, prm)
    return out.reshape(B, C, H, W)


def res_block_forward(x_nchw, params1, params2, *, matmul_dtype=jnp.bfloat16):
    """ResBlock forward.  x_nchw: (B, C, H, W) float32 (PyTorch layout).
    params: (conv_w (C,C,3,3) OIHW, conv_b (C,), in_gamma (C,), in_beta (C,))."""
    return _res_block_impl(x_nchw, params1, params2, _roll_shift_sign(),
                           matmul_dtype)


# ---------------- pure-JAX reference (sanity check) ----------------
def _ref_conv_block(x, w, b, g, beta):
    y = lax.conv_general_dilated(
        x, w, window_strides=(1, 1), padding=((1, 1), (1, 1)),
        dimension_numbers=("NCHW", "OIHW", "NCHW"))
    y = y + b[None, :, None, None]     # kernel omits this: IN cancels it exactly
    mean = jnp.mean(y, axis=(2, 3), keepdims=True)
    var = jnp.mean((y - mean) ** 2, axis=(2, 3), keepdims=True)
    y = (y - mean) * lax.rsqrt(var + EPS)
    y = y * g[None, :, None, None] + beta[None, :, None, None]
    return jnp.where(y > 0.0, y, NEG_SLOPE * y)


def _ref_res_block(x, params1, params2):
    y = _ref_conv_block(x, *params1)
    y = _ref_conv_block(y, *params2)
    return y + x


def _init_params(key, c):
    kw, kb, kg, kbt = jax.random.split(key, 4)
    w = jax.random.normal(kw, (c, c, 3, 3), jnp.float32) * 0.1
    b = jax.random.normal(kb, (c,), jnp.float32) * 0.05
    g = 1.0 + 0.05 * jax.random.normal(kg, (c,), jnp.float32)
    beta = 0.05 * jax.random.normal(kbt, (c,), jnp.float32)
    return (w, b, g, beta)


if __name__ == "__main__":
    B, C, H, W = 4, 4, 16, 16          # ResBlock: in_channels == out_channels
    key = jax.random.PRNGKey(0)
    kx, kp1, kp2 = jax.random.split(key, 3)

    x = jax.random.normal(kx, (B, C, H, W), jnp.float32)
    params1 = _init_params(kp1, C)
    params2 = _init_params(kp2, C)

    ref = jax.block_until_ready(_ref_res_block(x, params1, params2))

    # 1) f32 MXU operands: tight check of the fused kernel's logic.
    out32 = jax.block_until_ready(
        res_block_forward(x, params1, params2, matmul_dtype=jnp.float32))
    assert out32.shape == (B, C, H, W)
    err32 = float(jnp.max(jnp.abs(out32 - ref)))
    assert err32 < 5e-3, f"f32 kernel mismatch vs reference: {err32}"

    # 2) bf16 MXU operands (default fast path): looser tolerance purely from
    #    operand rounding; the logic itself is verified by the f32 run above.
    outbf = jax.block_until_ready(res_block_forward(x, params1, params2))
    errbf = float(jnp.max(jnp.abs(outbf - ref)))
    assert errbf < 1e-1, f"bf16 kernel mismatch vs reference: {errbf}"

    print("KERNEL_OK")
</pallas_src>

<mosaic_0001>
module attributes {stable_mosaic.version = 11 : i64} {
  func.func @_roll_probe_kernel(%arg0: memref<1x256xf32, #tpu.memory_space<vmem>>, %arg1: memref<1x256xf32, #tpu.memory_space<vmem>>) attributes {dimension_semantics = [], scalar_prefetch = 0 : i64, scratch_operands = 0 : i64, tpu.core_type = #tpu.core_type<tc>} {
    %c0 = arith.constant 0 : index
    %c0_0 = arith.constant 0 : index
    %0 = vector.load %arg0[%c0, %c0_0] : memref<1x256xf32, #tpu.memory_space<vmem>>, vector<1x256xf32>
    %c1_i32 = arith.constant 1 : i32
    %1 = tpu.dynamic_rotate %0 by %c1_i32 dim 1 : vector<1x256xf32>, i32 -> vector<1x256xf32>
    %c0_1 = arith.constant 0 : index
    %c0_2 = arith.constant 0 : index
    %2 = vector.load %arg1[%c0_1, %c0_2] : memref<1x256xf32, #tpu.memory_space<vmem>>, vector<1x256xf32>
    tpu.vector_store %arg1[%c0_1, %c0_2], %1 {strides = array<i32>} : memref<1x256xf32, #tpu.memory_space<vmem>>, vector<1x256xf32>,
    return
  }
}

</mosaic_0001>

<bundles_post_ra>
// kernel: tpu_custom_call.1
= control target key start
LH: loop header
LB: loop body
LE: loop exit
PB: predicated region body
PF: predicated region fallthrough
CT: control target
= control target key end

     0   :  { %6 = vsyncpa [#allocation3], 0  ;;  %s170_s0 = inlined_call_operand.hbm [shape: f32[1,256], index: 0, kind: input, shape index: {}]   ;;  %s171_s1 = inlined_call_operand.hbm [shape: f32[1,256], index: 1, kind: output, shape index: {}]  }
   0x1   :  { %7 = vsyncpa [#allocation4], 0  ;;  %s132_s6 = smov [#allocation2]   ;;  %s84_s10 = scalar_lea.hbm %s170_s0, 32 }
   0x2   :  { %s14_s7 = sshll.u32 %s132_s6, 4  ;;  %p85_p0 = scmp.ne.s32.totalorder %s170_s0, %s84_s10  ;;  %s15_s7 = int_to_ptr.vmem [resolvable:$true] %s14_s7 }
   0x3   :  { %p88_p1 = scmp.lt.u32.totalorder %s84_s10, %s170_s0 }
   0x5   :  { %p90_p2 = pnand %p88_p1, %p85_p0 }
   0x7   :  { %93 = shalt.err (!%p90_p2)
}
   0x8   :  { %s94_s15 = scalar_lea.vmem %s15_s7, 32  ;;  %p99_p4 = scmp.lt.s32.totalorder %s15_s7, %s15_s7 }
   0x9   :  { %p95_p3 = scmp.ne.s32.totalorder %s15_s7, %s94_s15  ;;  %p100_p5 = scmp.lt.s32.totalorder %s94_s15, %s94_s15 }
   0xb   :  { %p101_p6 = por %p100_p5, %p99_p4 }
   0xd   :  { %p102_p7 = pnand %p101_p6, %p95_p3 }
   0xf   :  { %105 = shalt.err (!%p102_p7)
}
  0x10   :  { %17 = dma.hbm_to_vmem [thread:$0]  %s170_s0, 32, %s15_s7, [#allocation3]  }
  0x11   :  { %128 = dma.done.wait [#allocation3], 32  }
  0x12   :  { %129 = vsyncadd [#allocation3], 4294967264  ;;  %v23_v0 = vlaneseq  ;;  %v21_v4 = vld [vmem:[#allocation2] sm:$0x3]  ;;  %s133_s18 = smov 1   ;;  %s135_s0 = smov [#allocation5]  }
  0x13   :  { %v134_v7 = vmov 1966171168   ;;  %s71_s19 = sshll.u32 %s135_s0, 4  ;;  %s72_s19 = int_to_ptr.vmem [resolvable:$true] %s71_s19 }
  0x14   :  { %v24_v1 = vshrl.u32 %v23_v0, 7  ;;  %v46_v8 = vunpack.c.l.s4 %v134_v7  ;;  %v38_v9 = vand.u32 127, %v23_v0  ;;  %vm62_vm1 = vcmp.lt.s32.totalorder %v23_v0, 256  ;;  %s106_s20 = scalar_lea.vmem %s72_s19, 32  ;;  %p111_p9 = scmp.lt.s32.totalorder %s72_s19, %s72_s19 }
  0x15   :  { %p107_p8 = scmp.ne.s32.totalorder %s72_s19, %s106_s20  ;;  %p112_p10 = scmp.lt.s32.totalorder %s106_s20, %s106_s20 }
  0x16   :  { %v25_v2 = vsub.s32 0, %v24_v1  ;;  %v29_v3 = vsub.s32 1, %v24_v1  ;;  %v47_v11 = vunpack.c.0.s8 %v46_v8  ;;  %vm39_vm0 = vcmp.lt.s32.totalorder %v38_v9, 1 }
  0x17   :  { %p113_p11 = por %p112_p10, %p111_p9 }
  0x18   :  { %v26_v5 = vrot.slane %v21_v4, %v25_v2  ;;  %v30_v6 = vrot.slane %v21_v4, %v29_v3  ;;  %v50_v12 = vsub.s32 %v47_v11, %v24_v1 }
  0x19   :  { %p114_p12 = pnand %p113_p11, %p107_p8 }
  0x1a   :  { %33 = vrot.lane.b32.xlu0 %v26_v5, %s133_s18 }
  0x1e   :  { %35 = vrot.lane.b32.xlu0 %v30_v6, %s133_s18 }
  0x8c   :  { %v34_v10 = vpop.permute.xlu0 %33 }
  0x90   :  { %v36_v13 = vpop.permute.xlu0 %35 }
  0x91   :  { %v40_v14 = vsel %vm39_vm0, %v34_v10, %v36_v13  ;;  %v41_v15 = vsel %vm39_vm0, %v36_v13, %v34_v10 }
  0x92   :  { %v44_v16 = vcombine.low %v41_v15, %v40_v14 }
  0x94   :  { %v51_v17 = vrot.slane %v44_v16, %v50_v12 }
  0x96   :  { %v58_v18 = vrot.slane %v51_v17, %v50_v12 }
  0x98   :  { %64 = vst.msk [vmem:[#allocation5] sm:$0x3] %vm62_vm1, %v58_v18 }
  0x99   :  { %117 = shalt.err (!%p114_p12)
}
  0x9a   :  { %s118_s23 = scalar_lea.hbm %s171_s1, 32 }
  0x9b   :  { %p119_p13 = scmp.ne.s32.totalorder %s171_s1, %s118_s23  ;;  %p122_p0 = scmp.lt.u32.totalorder %s118_s23, %s171_s1 }
  0x9d   :  { %p124_p1 = pnand %p122_p0, %p119_p13 }
  0x9f   :  { %127 = shalt.err (!%p124_p1)
}
  0xa0   :  { %74 = dma.vmem_to_hbm [thread:$0]  %s72_s19, 32, %s171_s1, [#allocation4]  }
  0xa1   :  { %130 = dma.done.wait [#allocation4], 32  }
  0xa2   :  { %131 = vsyncadd [#allocation4], 4294967264 }
  0xa3   :  { %78 = vsyncpa [#allocation3], 1 }
  0xa4   :  { %79 = vsyncpa [#allocation4], 1 }

</bundles_post_ra>
